<compile_context>
chip_gen: v7x
topology: tpu7x:2x2x1
jax: 0.10.0
libtpu: 0.0.40
codegen_flags: <defaults>
</compile_context>

<pallas_src>
import functools
from typing import Dict, List, Tuple

import jax
import jax.numpy as jnp
from jax.experimental import pallas as pl
from jax.experimental.pallas import tpu as pltpu


# Minimal stand-ins for the octopuscl schema value types.
CATEGORY = "category"
FLOAT = "float"
INTEGER = "integer"

_CE = "ce"
_MSE = "mse"

# Keep the double-buffered input blocks comfortably under the 32 MiB scoped
# VMEM default (v6e/v7x default; v7x physical VMEM is only 64 MiB).
_VMEM_BLOCK_BUDGET = 24 * 1024 * 1024
_OUT_LANES = 128


def _round_up(x: int, m: int) -> int:
    return ((x + m - 1) // m) * m


# ----------------------------- fused Pallas kernel ----------------------------- #

def _make_fused_kernel(kinds, dims, n_out):
    """Build the fused per-batch-tile loss kernel for a fixed schema signature."""

    def kernel(n_valid_ref, *refs):
        # refs layout: [pred_0, tgt_0, pred_1, tgt_1, ..., out, acc_scratch]
        in_refs = refs[: 2 * n_out]
        out_ref = refs[2 * n_out]
        acc_ref = refs[2 * n_out + 1]

        pid = pl.program_id(0)
        last = pl.num_programs(0) - 1

        @pl.when(pid == 0)
        def _init():
            acc_ref[...] = jnp.zeros_like(acc_ref)

        n_valid = n_valid_ref[0]                                   # int32 scalar (SMEM)
        lane = jax.lax.broadcasted_iota(jnp.int32, (1, _OUT_LANES), 1)

        updates = jnp.zeros((1, _OUT_LANES), jnp.float32)
        for i in range(n_out):
            p_ref = in_refs[2 * i]
            t_ref = in_refs[2 * i + 1]
            tb = p_ref.shape[0]

            # mask out padded batch rows (global row id >= true batch size)
            row_ids = pid * tb + jax.lax.broadcasted_iota(jnp.int32, (tb, 1), 0)
            valid = row_ids < n_valid                               # (tb, 1) bool

            if kinds[i] == _CE:
                logits = p_ref[...]                                 # (tb, C) native dtype
                labels = t_ref[...]                                 # (tb, 1) int32
                c = logits.shape[-1]
                row_max = jnp.max(logits, axis=-1, keepdims=True)
                shifted = (logits - row_max).astype(jnp.float32)    # promote per-op
                lse_shifted = jnp.log(
                    jnp.sum(jnp.exp(shifted), axis=-1, keepdims=True))
                class_ids = jax.lax.broadcasted_iota(jnp.int32, (tb, c), 1)
                one_hot = (class_ids == labels).astype(jnp.float32)
                # row_max folded away: lse - picked == lse_shifted - picked_shifted
                picked_shifted = jnp.sum(shifted * one_hot, axis=-1, keepdims=True)
                loss_rows = lse_shifted - picked_shifted            # (tb, 1) f32
                partial = jnp.sum(jnp.where(valid, loss_rows, 0.0))
            else:  # MSE
                diff = p_ref[...].astype(jnp.float32) - t_ref[...].astype(jnp.float32)
                sq = diff * diff                                    # (tb, D) f32
                partial = jnp.sum(jnp.where(valid, sq, 0.0))

            updates = jnp.where(lane == i, partial, updates)

        acc_ref[...] = acc_ref[...] + updates

        @pl.when(pid == last)
        def _finalize():
            n_valid_f = n_valid.astype(jnp.float32)
            div = jnp.ones((1, _OUT_LANES), jnp.float32)
            for i in range(n_out):
                if kinds[i] == _CE:
                    denom = n_valid_f                               # mean over batch
                else:
                    denom = n_valid_f * jnp.float32(dims[i])        # mean over all elems
                div = jnp.where(lane == i, denom, div)
            losses = acc_ref[...] / div
            losses = jnp.where(lane < n_out, losses, 0.0)
            total = jnp.sum(losses)
            # lane-dense output row: lanes [0..n_out-1] = per-output losses,
            # lane n_out = total loss, remaining lanes = 0.
            out_ref[...] = jnp.where(lane == n_out, total, losses)

    return kernel


@functools.lru_cache(maxsize=None)
def _build_fused_loss(signature):
    """signature = (batch, ((kind, inner_dim, pred_dtype, tgt_dtype), ...))."""
    batch, entries = signature
    n_out = len(entries)
    if n_out > _OUT_LANES - 1:
        raise ValueError("Too many schema outputs for a single lane-dense output row")

    kinds = tuple(e[0] for e in entries)
    dims = tuple(e[1] for e in entries)

    # Bytes consumed per batch row across all inputs (for VMEM-budgeted tiling).
    per_row_bytes = 0
    for kind, dim, pdt, tdt in entries:
        p_item = jnp.dtype(pdt).itemsize
        if kind == _CE:
            per_row_bytes += dim * p_item + 4            # logits row + int32 label
        else:
            per_row_bytes += dim * (p_item + jnp.dtype(tdt).itemsize)

    # Batch tile: up to 512 rows, shrunk until 2x double-buffered blocks fit VMEM.
    tb = min(512, _round_up(batch, 8))
    while tb > 8 and 2 * tb * per_row_bytes > _VMEM_BLOCK_BUDGET:
        tb //= 2
    tb = max(8, _round_up(tb, 8))
    b_pad = _round_up(batch, tb)
    steps = b_pad // tb

    kernel = _make_fused_kernel(kinds, dims, n_out)

    in_specs = []
    flops = 0
    transcendentals = 0
    bytes_accessed = _OUT_LANES * 4
    for kind, dim, pdt, tdt in entries:
        if kind == _CE:
            in_specs.append(pl.BlockSpec((tb, dim), lambda b, nv: (b, 0)))
            in_specs.append(pl.BlockSpec((tb, 1), lambda b, nv: (b, 0)))
            flops += 6 * batch * dim
            transcendentals += batch * dim
            bytes_accessed += batch * dim * jnp.dtype(pdt).itemsize + batch * 4
        else:
            in_specs.append(pl.BlockSpec((tb, dim), lambda b, nv: (b, 0)))
            in_specs.append(pl.BlockSpec((tb, dim), lambda b, nv: (b, 0)))
            flops += 3 * batch * dim
            bytes_accessed += batch * dim * (
                jnp.dtype(pdt).itemsize + jnp.dtype(tdt).itemsize)

    grid_spec = pltpu.PrefetchScalarGridSpec(
        num_scalar_prefetch=1,                   # n_valid (true batch size) in SMEM
        grid=(steps,),
        in_specs=in_specs,
        out_specs=pl.BlockSpec((1, _OUT_LANES), lambda b, nv: (0, 0)),
        scratch_shapes=[pltpu.VMEM((1, _OUT_LANES), jnp.float32)],
    )

    call = pl.pallas_call(
        kernel,
        out_shape=jax.ShapeDtypeStruct((1, _OUT_LANES), jnp.float32),
        grid_spec=grid_spec,
        compiler_params=pltpu.CompilerParams(
            dimension_semantics=("arbitrary",),   # batch axis is a reduction
            vmem_limit_bytes=32 * 1024 * 1024,
        ),
        cost_estimate=pl.CostEstimate(
            flops=flops,
            transcendentals=transcendentals,
            bytes_accessed=bytes_accessed,
        ),
    )

    @jax.jit
    def fused(*arrays):
        n_valid = jnp.array([batch], dtype=jnp.int32)
        padded = []
        for a in arrays:
            pad_rows = b_pad - a.shape[0]
            if pad_rows:
                a = jnp.pad(a, ((0, pad_rows), (0, 0)))
            padded.append(a)
        return call(n_valid, *padded)

    return fused


# ------------------------ BaseLossFunction (JAX/Pallas) ------------------------ #

class BaseLossFunctionPallas:
    """Pallas-backed equivalent of octopuscl BaseLossFunction (forward pass).

    dataset_schema_outputs: list of {'name': str, 'type': str} dicts.
    CATEGORY -> cross-entropy; FLOAT/INTEGER -> MSE. All losses for one batch
    are computed inside a single fused, batch-tiled Pallas kernel.
    """

    def __init__(self, dataset_schema_outputs: List[Dict[str, str]]):
        self.outputs = list(dataset_schema_outputs)
        for output in self.outputs:
            if output["type"] not in (CATEGORY, FLOAT, INTEGER):
                raise ValueError(f"Unsupported output type: {output['type']}")

    def __call__(
        self, outputs: Dict[str, jax.Array], targets: Dict[str, jax.Array]
    ) -> Tuple[jax.Array, Dict[str, jax.Array]]:
        arrays = []
        entries = []
        batch = None
        for output in self.outputs:
            name = output["name"]
            if name not in outputs or name not in targets:
                raise ValueError(f"Output {name} not found in outputs or targets")
            pred = outputs[name]
            tgt = targets[name]
            b = pred.shape[0]
            if batch is None:
                batch = b
            elif batch != b:
                raise ValueError("Inconsistent batch size across schema outputs")

            if output["type"] == CATEGORY:
                pred2d = pred.reshape(b, -1)
                tgt2d = tgt.astype(jnp.int32).reshape(b, 1)        # .long() analogue
                entries.append((_CE, int(pred2d.shape[1]),
                                str(pred2d.dtype), "int32"))
            else:
                pred2d = pred.reshape(b, -1)
                tgt2d = tgt.reshape(b, -1)
                if pred2d.shape != tgt2d.shape:
                    raise ValueError(f"Shape mismatch for output {name}")
                entries.append((_MSE, int(pred2d.shape[1]),
                                str(pred2d.dtype), str(tgt2d.dtype)))
            arrays.extend([pred2d, tgt2d])

        fused = _build_fused_loss((int(batch), tuple(entries)))
        out_row = fused(*arrays)

        n_out = len(self.outputs)
        loss_by_output = {o["name"]: out_row[0, i] for i, o in enumerate(self.outputs)}
        total_loss = out_row[0, n_out]
        return total_loss, loss_by_output


# -------------------------------- reference -------------------------------- #

def _ref_losses(schema, outs, tgts):
    total = jnp.float32(0.0)
    per = {}
    for o in schema:
        name = o["name"]
        if o["type"] == CATEGORY:
            logits = outs[name].astype(jnp.float32)
            labels = tgts[name].astype(jnp.int32)
            lse = jax.nn.logsumexp(logits, axis=-1)
            picked = jnp.take_along_axis(logits, labels[:, None], axis=-1)[:, 0]
            loss = jnp.mean(lse - picked)
        else:
            loss = jnp.mean(
                (outs[name].astype(jnp.float32) - tgts[name].astype(jnp.float32)) ** 2)
        per[name] = loss
        total = total + loss
    return total, per


def _check_case(schema, model_outputs, target_values):
    loss_fn = BaseLossFunctionPallas(schema)
    total_loss, loss_by_output = loss_fn(model_outputs, target_values)
    total_loss = jax.block_until_ready(total_loss)
    loss_by_output = jax.tree_util.tree_map(jax.block_until_ready, loss_by_output)

    ref_total, ref_per = _ref_losses(schema, model_outputs, target_values)
    for name, ref in ref_per.items():
        assert jnp.allclose(loss_by_output[name], ref, rtol=1e-5, atol=1e-5), name
    assert jnp.allclose(total_loss, ref_total, rtol=1e-5, atol=1e-5)
    return total_loss, loss_by_output


# ----------------------------------- main ----------------------------------- #

if __name__ == "__main__":
    key = jax.random.PRNGKey(0)

    schema = [
        {"name": "class_output", "type": CATEGORY},
        {"name": "reg_output", "type": FLOAT},
    ]

    # Case 1: tiny shapes (single grid step, no padding).
    k1, k2, k3, k4, key = jax.random.split(key, 5)
    batch, num_classes, reg_dim = 8, 8, 4
    model_outputs = {
        "class_output": jax.random.normal(k1, (batch, num_classes), dtype=jnp.float32),
        "reg_output": jax.random.normal(k2, (batch, reg_dim), dtype=jnp.float32),
    }
    target_values = {
        "class_output": jax.random.randint(k3, (batch,), 0, num_classes, dtype=jnp.int32),
        "reg_output": jax.random.normal(k4, (batch, reg_dim), dtype=jnp.float32),
    }
    _check_case(schema, model_outputs, target_values)

    # Case 2: batch not a multiple of 8 (exercises padding + row masking).
    k1, k2, k3, k4, key = jax.random.split(key, 5)
    batch, num_classes, reg_dim = 13, 5, 3
    model_outputs = {
        "class_output": jax.random.normal(k1, (batch, num_classes), dtype=jnp.float32),
        "reg_output": jax.random.normal(k2, (batch, reg_dim), dtype=jnp.float32),
    }
    target_values = {
        "class_output": jax.random.randint(k3, (batch,), 0, num_classes, dtype=jnp.int32),
        "reg_output": jax.random.normal(k4, (batch, reg_dim), dtype=jnp.float32),
    }
    _check_case(schema, model_outputs, target_values)

    # Case 3: multi-step batch grid (exercises the accumulator / pl.when path).
    k1, k2, k3, k4, key = jax.random.split(key, 5)
    batch, num_classes, reg_dim = 1040, 8, 4
    model_outputs = {
        "class_output": jax.random.normal(k1, (batch, num_classes), dtype=jnp.float32),
        "reg_output": jax.random.normal(k2, (batch, reg_dim), dtype=jnp.float32),
    }
    target_values = {
        "class_output": jax.random.randint(k3, (batch,), 0, num_classes, dtype=jnp.int32),
        "reg_output": jax.random.normal(k4, (batch, reg_dim), dtype=jnp.float32),
    }
    _check_case(schema, model_outputs, target_values)

    print("KERNEL_OK")
</pallas_src>

<mosaic_0001>
module attributes {stable_mosaic.version = 11 : i64} {
  func.func @kernel(%arg0: i32, %arg1: memref<1xi32, #tpu.memory_space<smem>>, %arg2: memref<8x8xf32, #tpu.memory_space<vmem>>, %arg3: memref<8x1xi32, #tpu.memory_space<vmem>>, %arg4: memref<8x4xf32, #tpu.memory_space<vmem>>, %arg5: memref<8x4xf32, #tpu.memory_space<vmem>>, %arg6: memref<1x128xf32, #tpu.memory_space<vmem>>, %arg7: memref<1x128xf32, #tpu.memory_space<vmem>>) attributes {dimension_semantics = [#tpu.dimension_semantics<arbitrary>], iteration_bounds = array<i64: 1>, scalar_prefetch = 1 : i64, scratch_operands = 1 : i64, tpu.core_type = #tpu.core_type<tc>, window_params = [{transform_indices = @transform_0, window_bounds = array<i64: 8, 8>}, {transform_indices = @transform_1, window_bounds = array<i64: 8, 1>}, {transform_indices = @transform_2, window_bounds = array<i64: 8, 4>}, {transform_indices = @transform_3, window_bounds = array<i64: 8, 4>}, {pipeline_mode = #tpu.pipeline_mode<synchronous>, transform_indices = @transform_4, window_bounds = array<i64: 1, 128>}]} {
    %c0_i32 = arith.constant 0 : i32
    %0 = arith.cmpi eq, %arg0, %c0_i32 : i32
    %1 = arith.extui %0 : i1 to i32
    %c0_i32_0 = arith.constant 0 : i32
    %2 = arith.cmpi ne, %1, %c0_i32_0 : i32
    scf.if %2 {
      %cst_24 = arith.constant 0.000000e+00 : f32
      %69 = vector.broadcast %cst_24 : f32 to vector<1x128xf32>
      %c0_25 = arith.constant 0 : index
      %c0_26 = arith.constant 0 : index
      %70 = vector.load %arg7[%c0_25, %c0_26] : memref<1x128xf32, #tpu.memory_space<vmem>>, vector<1x128xf32>
      tpu.vector_store %arg7[%c0_25, %c0_26], %69 {strides = array<i32>} : memref<1x128xf32, #tpu.memory_space<vmem>>, vector<1x128xf32>,
    } else {
    }
    %c0 = arith.constant 0 : index
    %3 = memref.load %arg1[%c0] : memref<1xi32, #tpu.memory_space<smem>>
    %4 = tpu.iota {dimensions = array<i32: 1>} : vector<1x128xi32>
    %cst = arith.constant 0.000000e+00 : f32
    %5 = vector.broadcast %cst : f32 to vector<1x128xf32>
    %c8_i32 = arith.constant 8 : i32
    %6 = arith.muli %arg0, %c8_i32 : i32
    %7 = tpu.iota {dimensions = array<i32: 0>} : vector<8x1xi32>
    %8 = vector.broadcast %6 : i32 to vector<8x1xi32>
    %9 = arith.addi %8, %7 : vector<8x1xi32>
    %10 = vector.broadcast %3 : i32 to vector<8x1xi32>
    %11 = arith.cmpi slt, %9, %10 : vector<8x1xi32>
    %c0_1 = arith.constant 0 : index
    %c0_2 = arith.constant 0 : index
    %12 = vector.load %arg2[%c0_1, %c0_2] : memref<8x8xf32, #tpu.memory_space<vmem>>, vector<8x8xf32>
    %c0_3 = arith.constant 0 : index
    %c0_4 = arith.constant 0 : index
    %13 = vector.load %arg3[%c0_3, %c0_4] : memref<8x1xi32, #tpu.memory_space<vmem>>, vector<8x1xi32>
    %cst_5 = arith.constant dense<0xFF800000> : vector<8xf32>
    %14 = vector.multi_reduction <maximumf>, %12, %cst_5 [1] : vector<8x8xf32> to vector<8xf32>
    %15 = vector.shape_cast %14 : vector<8xf32> to vector<8x1xf32>
    %16 = vector.broadcast %15 : vector<8x1xf32> to vector<8x8xf32>
    %17 = arith.subf %12, %16 : vector<8x8xf32>
    %18 = math.exp %17 : vector<8x8xf32>
    %cst_6 = arith.constant dense<0.000000e+00> : vector<8xf32>
    %19 = vector.multi_reduction <add>, %18, %cst_6 [1] : vector<8x8xf32> to vector<8xf32>
    %20 = vector.shape_cast %19 : vector<8xf32> to vector<8x1xf32>
    %21 = math.log %20 : vector<8x1xf32>
    %22 = tpu.iota {dimensions = array<i32: 1>} : vector<8x8xi32>
    %23 = vector.broadcast %13 : vector<8x1xi32> to vector<8x8xi32>
    %24 = arith.cmpi eq, %22, %23 : vector<8x8xi32>
    %25 = arith.extui %24 : vector<8x8xi1> to vector<8x8xi32>
    %26 = arith.sitofp %25 : vector<8x8xi32> to vector<8x8xf32>
    %27 = arith.mulf %17, %26 : vector<8x8xf32>
    %cst_7 = arith.constant dense<0.000000e+00> : vector<8xf32>
    %28 = vector.multi_reduction <add>, %27, %cst_7 [1] : vector<8x8xf32> to vector<8xf32>
    %29 = vector.shape_cast %28 : vector<8xf32> to vector<8x1xf32>
    %30 = arith.subf %21, %29 : vector<8x1xf32>
    %cst_8 = arith.constant 0.000000e+00 : f32
    %31 = vector.broadcast %cst_8 : f32 to vector<8x1xf32>
    %32 = arith.select %11, %30, %31 : vector<8x1xi1>, vector<8x1xf32>
    %33 = vector.shape_cast %32 : vector<8x1xf32> to vector<1x8x1xf32>
    %cst_9 = arith.constant dense<0.000000e+00> : vector<1xf32>
    %34 = vector.multi_reduction <add>, %33, %cst_9 [1, 2] : vector<1x8x1xf32> to vector<1xf32>
    %35 = vector.shape_cast %34 : vector<1xf32> to vector<1x1x1xf32>
    %36 = vector.extract %35[0, 0, 0] : f32 from vector<1x1x1xf32>
    %c0_i32_10 = arith.constant 0 : i32
    %37 = vector.broadcast %c0_i32_10 : i32 to vector<1x128xi32>
    %38 = arith.cmpi eq, %4, %37 : vector<1x128xi32>
    %39 = vector.broadcast %36 : f32 to vector<1x128xf32>
    %40 = arith.select %38, %39, %5 : vector<1x128xi1>, vector<1x128xf32>
    %c8_i32_11 = arith.constant 8 : i32
    %41 = arith.muli %arg0, %c8_i32_11 : i32
    %42 = tpu.iota {dimensions = array<i32: 0>} : vector<8x1xi32>
    %43 = vector.broadcast %41 : i32 to vector<8x1xi32>
    %44 = arith.addi %43, %42 : vector<8x1xi32>
    %45 = vector.broadcast %3 : i32 to vector<8x1xi32>
    %46 = arith.cmpi slt, %44, %45 : vector<8x1xi32>
    %c0_12 = arith.constant 0 : index
    %c0_13 = arith.constant 0 : index
    %47 = vector.load %arg4[%c0_12, %c0_13] : memref<8x4xf32, #tpu.memory_space<vmem>>, vector<8x4xf32>
    %c0_14 = arith.constant 0 : index
    %c0_15 = arith.constant 0 : index
    %48 = vector.load %arg5[%c0_14, %c0_15] : memref<8x4xf32, #tpu.memory_space<vmem>>, vector<8x4xf32>
    %49 = arith.subf %47, %48 : vector<8x4xf32>
    %50 = arith.mulf %49, %49 : vector<8x4xf32>
    %cst_16 = arith.constant 0.000000e+00 : f32
    %51 = vector.shape_cast %46 : vector<8x1xi1> to vector<8x1xi1>
    %52 = vector.broadcast %51 : vector<8x1xi1> to vector<8x4xi1>
    %53 = vector.broadcast %cst_16 : f32 to vector<8x4xf32>
    %54 = arith.select %52, %50, %53 : vector<8x4xi1>, vector<8x4xf32>
    %55 = vector.shape_cast %54 : vector<8x4xf32> to vector<1x8x4xf32>
    %cst_17 = arith.constant dense<0.000000e+00> : vector<1xf32>
    %56 = vector.multi_reduction <add>, %55, %cst_17 [1, 2] : vector<1x8x4xf32> to vector<1xf32>
    %57 = vector.shape_cast %56 : vector<1xf32> to vector<1x1x1xf32>
    %58 = vector.extract %57[0, 0, 0] : f32 from vector<1x1x1xf32>
    %c1_i32 = arith.constant 1 : i32
    %59 = vector.broadcast %c1_i32 : i32 to vector<1x128xi32>
    %60 = arith.cmpi eq, %4, %59 : vector<1x128xi32>
    %61 = vector.broadcast %58 : f32 to vector<1x128xf32>
    %62 = arith.select %60, %61, %40 : vector<1x128xi1>, vector<1x128xf32>
    %c0_18 = arith.constant 0 : index
    %c0_19 = arith.constant 0 : index
    %63 = vector.load %arg7[%c0_18, %c0_19] : memref<1x128xf32, #tpu.memory_space<vmem>>, vector<1x128xf32>
    %64 = arith.addf %63, %62 : vector<1x128xf32>
    %c0_20 = arith.constant 0 : index
    %c0_21 = arith.constant 0 : index
    %65 = vector.load %arg7[%c0_20, %c0_21] : memref<1x128xf32, #tpu.memory_space<vmem>>, vector<1x128xf32>
    tpu.vector_store %arg7[%c0_20, %c0_21], %64 {strides = array<i32>} : memref<1x128xf32, #tpu.memory_space<vmem>>, vector<1x128xf32>,
    %c0_i32_22 = arith.constant 0 : i32
    %66 = arith.cmpi eq, %arg0, %c0_i32_22 : i32
    %67 = arith.extui %66 : i1 to i32
    %c0_i32_23 = arith.constant 0 : i32
    %68 = arith.cmpi ne, %67, %c0_i32_23 : i32
    scf.if %68 {
      %69 = arith.sitofp %3 : i32 to f32
      %cst_24 = arith.constant 1.000000e+00 : f32
      %70 = vector.broadcast %cst_24 : f32 to vector<1x128xf32>
      %c0_i32_25 = arith.constant 0 : i32
      %71 = vector.broadcast %c0_i32_25 : i32 to vector<1x128xi32>
      %72 = arith.cmpi eq, %4, %71 : vector<1x128xi32>
      %73 = vector.broadcast %69 : f32 to vector<1x128xf32>
      %74 = arith.select %72, %73, %70 : vector<1x128xi1>, vector<1x128xf32>
      %cst_26 = arith.constant 4.000000e+00 : f32
      %75 = arith.mulf %69, %cst_26 : f32
      %c1_i32_27 = arith.constant 1 : i32
      %76 = vector.broadcast %c1_i32_27 : i32 to vector<1x128xi32>
      %77 = arith.cmpi eq, %4, %76 : vector<1x128xi32>
      %78 = vector.broadcast %75 : f32 to vector<1x128xf32>
      %79 = arith.select %77, %78, %74 : vector<1x128xi1>, vector<1x128xf32>
      %c0_28 = arith.constant 0 : index
      %c0_29 = arith.constant 0 : index
      %80 = vector.load %arg7[%c0_28, %c0_29] : memref<1x128xf32, #tpu.memory_space<vmem>>, vector<1x128xf32>
      %81 = arith.divf %80, %79 : vector<1x128xf32>
      %c2_i32 = arith.constant 2 : i32
      %82 = vector.broadcast %c2_i32 : i32 to vector<1x128xi32>
      %83 = arith.cmpi slt, %4, %82 : vector<1x128xi32>
      %cst_30 = arith.constant 0.000000e+00 : f32
      %84 = vector.broadcast %cst_30 : f32 to vector<1x128xf32>
      %85 = arith.select %83, %81, %84 : vector<1x128xi1>, vector<1x128xf32>
      %86 = vector.shape_cast %85 : vector<1x128xf32> to vector<1x1x128xf32>
      %cst_31 = arith.constant dense<0.000000e+00> : vector<1xf32>
      %87 = vector.multi_reduction <add>, %86, %cst_31 [1, 2] : vector<1x1x128xf32> to vector<1xf32>
      %88 = vector.shape_cast %87 : vector<1xf32> to vector<1x1x1xf32>
      %89 = vector.extract %88[0, 0, 0] : f32 from vector<1x1x1xf32>
      %c2_i32_32 = arith.constant 2 : i32
      %90 = vector.broadcast %c2_i32_32 : i32 to vector<1x128xi32>
      %91 = arith.cmpi eq, %4, %90 : vector<1x128xi32>
      %92 = vector.broadcast %89 : f32 to vector<1x128xf32>
      %93 = arith.select %91, %92, %85 : vector<1x128xi1>, vector<1x128xf32>
      %c0_33 = arith.constant 0 : index
      %c0_34 = arith.constant 0 : index
      %94 = vector.load %arg6[%c0_33, %c0_34] : memref<1x128xf32, #tpu.memory_space<vmem>>, vector<1x128xf32>
      tpu.vector_store %arg6[%c0_33, %c0_34], %93 {strides = array<i32>} : memref<1x128xf32, #tpu.memory_space<vmem>>, vector<1x128xf32>,
    } else {
    }
    return
  }
  func.func @transform_0(%arg0: i32, %arg1: memref<1xi32, #tpu.memory_space<smem>>) -> (i32, i32) {
    %c0_i32 = arith.constant 0 : i32
    %c0_i32_0 = arith.constant 0 : i32
    return %arg0, %c0_i32 : i32, i32
  }
  func.func @transform_1(%arg0: i32, %arg1: memref<1xi32, #tpu.memory_space<smem>>) -> (i32, i32) {
    %c0_i32 = arith.constant 0 : i32
    %c0_i32_0 = arith.constant 0 : i32
    return %arg0, %c0_i32 : i32, i32
  }
  func.func @transform_2(%arg0: i32, %arg1: memref<1xi32, #tpu.memory_space<smem>>) -> (i32, i32) {
    %c0_i32 = arith.constant 0 : i32
    %c0_i32_0 = arith.constant 0 : i32
    return %arg0, %c0_i32 : i32, i32
  }
  func.func @transform_3(%arg0: i32, %arg1: memref<1xi32, #tpu.memory_space<smem>>) -> (i32, i32) {
    %c0_i32 = arith.constant 0 : i32
    %c0_i32_0 = arith.constant 0 : i32
    return %arg0, %c0_i32 : i32, i32
  }
  func.func @transform_4(%arg0: i32, %arg1: memref<1xi32, #tpu.memory_space<smem>>) -> (i32, i32) {
    %c0_i32 = arith.constant 0 : i32
    %c0_i32_0 = arith.constant 0 : i32
    %c0_i32_1 = arith.constant 0 : i32
    return %c0_i32, %c0_i32_0 : i32, i32
  }
}

</mosaic_0001>

<bundles_post_ra>
// kernel: fused.1
= control target key start
LH: loop header
LB: loop body
LE: loop exit
PB: predicated region body
PF: predicated region fallthrough
CT: control target
= control target key end

     0   :  { %vm37_vm0 = vcmask 64512   ;;  %s256_s0 = inlined_call_operand.<no memory space> [shape: s32[1], index: 0, kind: input, shape index: {}]   ;;  %s257_s1 = inlined_call_operand.vmem [shape: f32[8,8], index: 1, kind: input, shape index: {}]   ;;  %s258_s2 = inlined_call_operand.vmem [shape: s32[8,1], index: 2, kind: input, shape index: {}]   ;;  %s259_s3 = inlined_call_operand.vmem [shape: f32[8,4], index: 3, kind: input, shape index: {}]   ;;  %s260_s4 = inlined_call_operand.vmem [shape: f32[8,4], index: 4, kind: input, shape index: {}]   ;;  %s261_s5 = inlined_call_operand.hbm [shape: f32[1,128], index: 5, kind: output, shape index: {}]  }
   0x1   :  { %v35_v0 = vld [vmem:[%s257_s1] sm:$0xff] }
   0x2   :  { %11 = vsyncpa [#allocation6], 0  ;;  %v38_v1 = vsel %vm37_vm0, %v35_v0, -inf  ;;  %v183_v2 = vmov 0   ;;  %v36_v3 = vld [vmem:[%s258_s2] sm:$0xff]  ;;  %v184_v4 = vmov 0.0   ;;  %v26_v7 = vlaneseq  ;;  %s102_s26 = scvt.s32.f32 %s256_s0 }
   0x3   :  { %152 = vset.pattern.permute.xlu0 %v183_v2  ;;  %24 = vst [vmem:[#allocation2] sm:$0x1] %v184_v4  ;;  %v75_v17 = vld [vmem:[%s259_s3] sm:$0xff]  ;;  %v33_v21 = vstv %s256_s0  ;;  %vm61_vm3 = vcmask 7168   ;;  %vm82_vm4 = vcmask 31744   ;;  %vm113_vm8 = vcmask 1040384  }
   0x4   :  { %39 = vmax.xlane.f32.xlu0 %v38_v1  ;;  %v223_v9 = vand.u32 127, %v26_v7  ;;  %v76_v18 = vld [vmem:[%s260_s4] sm:$0xff]  ;;  %v30_v20 = vshrl.u32 %v26_v7, 7  ;;  %s105_s27 = smul.f32 4.0, %s102_s26  ;;  %v103_v45 = vstv %s102_s26  ;;  %s185_s0 = smov [#allocation5]  }
   0x5   :  { %v77_v19 = vsub.f32 %v75_v17, %v76_v18  ;;  %s134_s30 = sshll.u32 %s185_s0, 4  ;;  %s135_s30 = int_to_ptr.vmem [resolvable:$true] %s134_s30 }
   0x6   :  { %vm34_vm2 = vcmp.lt.s32.totalorder %v30_v20, %v33_v21  ;;  %vm72_vm5 = vcmp.eq.s32.totalorder %v223_v9, 0  ;;  %v106_v47 = vstv %s105_s27  ;;  %vm93_vm6 = vcmp.eq.s32.totalorder %v223_v9, 1  ;;  %s159_s7 = scalar_lea.vmem %s135_s30, 16  ;;  %s163_s8 = scalar_lea.vmem %s135_s30, 32 }
   0x7   :  { %v78_v24 = vmul.f32 %v77_v19, %v77_v19  ;;  %v104_v46 = vsel %vm72_vm5, %v103_v45, 1.0  ;;  %vm111_vm7 = vcmp.lt.s32.totalorder %v223_v9, 2  ;;  %vm124_vm9 = vcmp.eq.s32.totalorder %v223_v9, 2  ;;  %p160_p0 = scmp.ne.s32.totalorder %s135_s30, %s159_s7  ;;  %p164_p1 = scmp.lt.s32.totalorder %s135_s30, %s135_s30 }
   0x8   :  { %v107_v48 = vsel %vm93_vm6, %v106_v47, %v104_v46  ;;  %p165_p2 = scmp.lt.s32.totalorder %s163_s8, %s159_s7 }
   0x9   :  { %v81_v28 = vsel %vm34_vm2, %v78_v24, 0.0 }
   0xa   :  { %v83_v30 = vsel %vm82_vm4, %v81_v28, 0.0  ;;  %v96_v50 = vld [vmem:[#allocation2] sm:$0x1]  ;;  %p166_p3 = por %p165_p2, %p164_p1 }
   0xc   :  { %p167_p4 = pnand %p166_p3, %p160_p0 }
  0x1a   :  { %50 = vperm.xlu0 %152, %v36_v3  }
  0x91   :  { %v40_v5 = vpop.xlane.xlu0 %39 }
  0x92   :  { %v41_v6 = vsub.f32 %v35_v0, %v40_v5 }
  0x94   :  { %v42_v8 = vmul.f32 1.442695, %v41_v6 }
  0x96   :  { %153 = vpow2.f32 %v42_v8 }
  0x99   :  { %v51_v10 = vpop.permute.xlu0 %50 }
  0x9a   :  { %vm52_vm1 = vcmp.eq.s32.totalorder %v223_v9, %v51_v10 }
  0x9b   :  { %v142_v11 = vsel %vm52_vm1, 1.0, %v184_v4 }
  0x9c   :  { %v55_v14 = vmul.f32 %v142_v11, %v41_v6 }
  0x9e   :  { %v56_v15 = vsel %vm37_vm0, %v55_v14, 0.0 }
  0xa0   :  { %v154_v12 = vpop.eup %153 }
  0xa1   :  { %v44_v13 = vsel %vm37_vm0, %v154_v12, 0.0 }
  0xa2   :  { %45 = vadd.xlane.f32.xlu1 %v44_v13 }
  0xa6   :  { %57 = vadd.xlane.f32.xlu1 %v56_v15 }
 0x12f   :  { %v46_v16 = vpop.xlane.xlu1 %45 }
 0x130   :  { %155 = vlog2.f32 %v46_v16 }
 0x131   :  { %157 = vrcp.f32 %v107_v48 }
 0x133   :  { %v58_v25 = vpop.xlane.xlu1 %57 }
 0x13a   :  { %v156_v22 = vpop.eup %155 }
 0x13b   :  { %v48_v23 = vmul.f32 0.6931472, %v156_v22  ;;  %v158_v55 = vpop.eup %157 }
 0x13d   :  { %v59_v26 = vsub.f32 %v48_v23, %v58_v25 }
 0x13f   :  { %v60_v27 = vsel %vm34_vm2, %v59_v26, 0.0 }
 0x140   :  { %v62_v29 = vsel %vm61_vm3, %v60_v27, 0.0 }
 0x141   :  { %63 = vadd.xlane.f32.xlu1 %v62_v29 }
 0x145   :  { %84 = vadd.xlane.f32.xlu1 %v83_v30 }
 0x1ce   :  { %v64_v31 = vpop.xlane.xlu1 %63 }
 0x1cf   :  { %v65_v32 = vrot.slane %v64_v31, 4 }
 0x1d1   :  { %v66_v33 = vadd.f32 %v65_v32, %v64_v31 }
 0x1d2   :  { %v85_v34 = vpop.xlane.xlu1 %84 }
 0x1d3   :  { %v67_v35 = vrot.slane %v66_v33, 2  ;;  %v86_v36 = vrot.slane %v85_v34, 4 }
 0x1d5   :  { %v87_v37 = vadd.f32 %v86_v36, %v85_v34  ;;  %v68_v38 = vadd.f32 %v67_v35, %v66_v33 }
 0x1d7   :  { %v88_v39 = vrot.slane %v87_v37, 2  ;;  %v69_v40 = vrot.slane %v68_v38, 1 }
 0x1d9   :  { %v70_v41 = vadd.f32 %v69_v40, %v68_v38  ;;  %v89_v42 = vadd.f32 %v88_v39, %v87_v37 }
 0x1db   :  { %143 = vpush %v70_v41  ;;  %v90_v43 = vrot.slane %v89_v42, 1 }
 0x1dd   :  { %v91_v44 = vadd.f32 %v90_v43, %v89_v42 }
 0x1df   :  { %145 = vpush %v91_v44 }
 0x20c   :  { %s144_s28 = spop %143 }
 0x20d   :  { %v73_v49 = vstv %s144_s28 }
 0x20e   :  { %v74_v51 = vsel %vm72_vm5, %v73_v49, 0.0 }
 0x210   :  { %s146_s29 = spop %145 }
 0x211   :  { %v94_v52 = vstv %s146_s29 }
 0x212   :  { %v95_v53 = vsel %vm93_vm6, %v94_v52, %v74_v51 }
 0x213   :  { %v97_v54 = vadd.f32 %v96_v50, %v95_v53 }
 0x215   :  { %98 = vst [vmem:[#allocation2] sm:$0x1] %v97_v54 }
 0x21c   :  { %v108_v56 = vld [vmem:[#allocation2] sm:$0x1] }
 0x21d   :  { %v110_v57 = vmul.f32 %v158_v55, %v108_v56 }
 0x21f   :  { %v112_v58 = vsel %vm111_vm7, %v110_v57, 0.0 }
 0x220   :  { %v114_v59 = vsel %vm113_vm8, %v112_v58, 0.0 }
 0x221   :  { %115 = vadd.xlane.f32.xlu1 %v114_v59 }
 0x2ae   :  { %v116_v60 = vpop.xlane.xlu1 %115 }
 0x2af   :  { %v117_v61 = vrot.slane %v116_v60, 4 }
 0x2b1   :  { %v118_v62 = vadd.f32 %v117_v61, %v116_v60 }
 0x2b3   :  { %v119_v63 = vrot.slane %v118_v62, 2 }
 0x2b5   :  { %v120_v0 = vadd.f32 %v119_v63, %v118_v62 }
 0x2b7   :  { %v121_v1 = vrot.slane %v120_v0, 1 }
 0x2b9   :  { %v122_v2 = vadd.f32 %v121_v1, %v120_v0 }
 0x2bb   :  { %147 = vpush %v122_v2 }
 0x2ec   :  { %s148_s6 = spop %147 }
 0x2ed   :  { %v125_v3 = vstv %s148_s6 }
 0x2ee   :  { %v126_v4 = vsel %vm124_vm9, %v125_v3, %v112_v58 }
 0x2ef   :  { %127 = vst [vmem:[#allocation5] sm:$0x1] %v126_v4 }
 0x2f0   :  { %170 = shalt.err (!%p167_p4)
}
 0x2f1   :  { %s171_s11 = scalar_lea.hbm %s261_s5, 16 }
 0x2f2   :  { %p172_p5 = scmp.ne.s32.totalorder %s261_s5, %s171_s11  ;;  %p175_p6 = scmp.lt.u32.totalorder %s171_s11, %s261_s5 }
 0x2f4   :  { %p177_p7 = pnand %p175_p6, %p172_p5 }
 0x2f6   :  { %180 = shalt.err (!%p177_p7)
}
 0x2f7   :  { %137 = dma.vmem_to_hbm [thread:$0]  %s135_s30, 16, %s261_s5, [#allocation6]  }
 0x2f8   :  { %181 = dma.done.wait [#allocation6], 16  }
 0x2f9   :  { %182 = vsyncadd [#allocation6], 4294967280 }
 0x2fa   :  { %141 = vsyncpa [#allocation6], 1 }

</bundles_post_ra>
